<compile_context>
chip_gen: v7x
topology: tpu7x:2x2x1
jax: 0.10.0
libtpu: 0.0.40
codegen_flags: <defaults>
</compile_context>

<pallas_src>
import functools

import jax
import jax.numpy as jnp
from jax.experimental import pallas as pl
from jax.experimental.pallas import tpu as pltpu


def _round_up(n, m):
    return ((n + m - 1) // m) * m


# ----------------------------------------------------------------------------
# Fused TemporalBlock kernel
# ----------------------------------------------------------------------------
def _temporal_block_kernel(x_ref, w1_ref, b1_ref, w2_ref, b2_ref, *rest,
                           K, dilation, TT, H, H_pad, has_downsample):
    """One (batch, time-tile) step of the fused TemporalBlock.

    x_ref  : (1, TT, Cin_p)         current input tile (compute dtype, bf16)
    w1_ref : (K, Cin_p, Cout_p)     conv1 weight (per-tap slabs)
    b1_ref : (1, Cout_p)            f32
    w2_ref : (K, Cout_p, Cout_p)    conv2 weight
    b2_ref : (1, Cout_p)            f32
    [wds_ref: (Cin_p, Cout_p), bds_ref: (1, Cout_p)]   optional 1x1 downsample
    o_ref  : (1, TT, Cout_p)        output tile
    [xp_ref : (H_pad+TT, Cin_p)     VMEM scratch: causal halo + current x
     h1p_ref: (H_pad+TT, Cout_p)    VMEM scratch: causal halo + current h1]
    """
    idx = 0
    if has_downsample:
        wds_ref, bds_ref = rest[idx], rest[idx + 1]
        idx += 2
    o_ref = rest[idx]
    idx += 1
    if K > 1:
        xp_ref, h1p_ref = rest[idx], rest[idx + 1]

    j = pl.program_id(1)
    # Tap k of output row t reads halo-buffer row (t + base + k*dilation).
    base = H_pad - H

    if K > 1:
        # Zero the causal halo at the first time tile of every batch row: this
        # is exactly the left zero padding of conv1d(padding=(K-1)*d)+Chomp1d.
        @pl.when(j == 0)
        def _():
            xp_ref[0:H_pad, :] = jnp.zeros((H_pad, xp_ref.shape[1]),
                                           xp_ref.dtype)
            h1p_ref[0:H_pad, :] = jnp.zeros((H_pad, h1p_ref.shape[1]),
                                            h1p_ref.dtype)

    x_tile = x_ref[0]                                   # (TT, Cin_p)
    if K > 1:
        xp_ref[H_pad:H_pad + TT, :] = x_tile            # current tile -> buffer

    # ---- conv1 (causal, dilated): K accumulated MXU matmuls, f32 accumulator.
    # Tap K-1 (offset base+(K-1)*d == H_pad) is the current tile: use registers.
    h1 = jnp.dot(x_tile, w1_ref[K - 1], preferred_element_type=jnp.float32)
    for k in range(K - 1):
        off = base + k * dilation
        h1 = h1 + jnp.dot(xp_ref[off:off + TT, :], w1_ref[k],
                          preferred_element_type=jnp.float32)
    h1 = jnp.maximum(h1 + b1_ref[...], 0.0)
    # dropout1: identity (eval mode)

    h1_c = h1.astype(x_tile.dtype)                      # bf16 for MXU / halo
    if K > 1:
        h1p_ref[H_pad:H_pad + TT, :] = h1_c

    # ---- conv2 (causal, dilated) + bias + ReLU ------------------------------
    out = jnp.dot(h1_c, w2_ref[K - 1], preferred_element_type=jnp.float32)
    for k in range(K - 1):
        off = base + k * dilation
        out = out + jnp.dot(h1p_ref[off:off + TT, :], w2_ref[k],
                            preferred_element_type=jnp.float32)
    out = jnp.maximum(out + b2_ref[...], 0.0)
    # dropout2: identity (eval mode)

    # ---- residual path (identity or 1x1 conv) -------------------------------
    if has_downsample:
        res = jnp.dot(x_tile, wds_ref[...], preferred_element_type=jnp.float32)
        res = res + bds_ref[...]
    else:
        res = x_tile.astype(jnp.float32)

    o_ref[0] = jnp.maximum(out + res, 0.0).astype(o_ref.dtype)

    # ---- carry the causal halo (last H_pad timesteps) to the next tile ------
    if K > 1:
        if H_pad <= TT:
            # Carry straight from in-register tile tails: no scratch re-loads.
            xp_ref[0:H_pad, :] = x_tile[TT - H_pad:, :]
            h1p_ref[0:H_pad, :] = h1_c[TT - H_pad:, :]
        else:
            # Ranges overlap (H_pad > TT): materialize to registers, then store.
            x_carry = xp_ref[TT:TT + H_pad, :]
            h_carry = h1p_ref[TT:TT + H_pad, :]
            xp_ref[0:H_pad, :] = x_carry
            h1p_ref[0:H_pad, :] = h_carry


# ----------------------------------------------------------------------------
# VMEM footprint estimate (used both for time-tile selection and vmem_limit)
# ----------------------------------------------------------------------------
def _vmem_estimate(TT, Cin_p, Cout_p, K, H_pad, has_ds, cbytes, obytes, wbuf):
    act = 2 * TT * Cin_p * cbytes + 2 * TT * Cout_p * obytes       # pipelined in/out
    halo = ((H_pad + TT) * (Cin_p + Cout_p) * cbytes) if K > 1 else 0
    wrows = K * Cin_p + K * Cout_p + (Cin_p if has_ds else 0)
    weights = wbuf * wrows * Cout_p * cbytes
    biases = wbuf * 3 * Cout_p * 4
    interm = 4 * TT * Cout_p * 4 + TT * Cin_p * 4                   # f32 acc/temps
    return act + halo + weights + biases + interm


# ----------------------------------------------------------------------------
# Wrapper
# ----------------------------------------------------------------------------
def temporal_block(x, params, *, kernel_size, dilation, time_tile=None,
                   compute_dtype=jnp.bfloat16, out_dtype=None,
                   single_buffer_weights=True, interpret=False):
    """Fused TemporalBlock forward.  x: (B, T, Cin) -> (B, T, Cout)."""
    B, T, Cin = x.shape
    K = kernel_size
    w1, b1 = params["w1"], params["b1"]           # (K, Cin, Cout), (Cout,)
    w2, b2 = params["w2"], params["b2"]           # (K, Cout, Cout), (Cout,)
    Cout = w1.shape[2]
    has_ds = "w_ds" in params
    assert has_ds == (Cin != Cout), "downsample must exist iff Cin != Cout"

    compute_dtype = jnp.dtype(compute_dtype)
    out_dtype = jnp.dtype(out_dtype) if out_dtype is not None else x.dtype
    cbytes = compute_dtype.itemsize
    obytes = jnp.dtype(out_dtype).itemsize
    sub = 16 if cbytes < 4 else 8                 # sublane packing of compute dtype

    Cin_p = _round_up(Cin, 128)
    Cout_p = _round_up(Cout, 128)
    H = (K - 1) * dilation                        # causal receptive-field halo
    H_pad = _round_up(H, sub) if K > 1 else 0

    # ---- generation-aware VMEM budget & time-tile selection -----------------
    try:
        vmem_cap = int(pltpu.get_tpu_info().vmem_capacity_bytes)
    except Exception:
        vmem_cap = 64 << 20                       # conservative (v7x per-TC)
    wbuf = 1 if single_buffer_weights else 2
    budget = max(int(vmem_cap * 0.70) - (8 << 20), 4 << 20)

    T_cap = _round_up(T, sub)
    if time_tile is None:
        TT = sub
        for cand in (2048, 1536, 1024, 768, 512, 384, 256, 192, 128, 96, 64,
                     48, 32, 16, 8):
            cand = min(_round_up(cand, sub), T_cap)
            if _vmem_estimate(cand, Cin_p, Cout_p, K, H_pad, has_ds, cbytes,
                              obytes, wbuf) <= budget:
                TT = cand
                break
    else:
        TT = min(_round_up(time_tile, sub), T_cap)
    T_pad = _round_up(T, TT)
    nT = T_pad // TT

    # ---- pad & cast operands (skip the pad copy when already aligned) -------
    if (Cin != Cin_p) or (T != T_pad):
        xk = jnp.zeros((B, T_pad, Cin_p), compute_dtype)
        xk = xk.at[:, :T, :Cin].set(x.astype(compute_dtype))
    else:
        xk = x.astype(compute_dtype)

    def _pad_w(w, ci, co):
        wp = jnp.zeros((w.shape[0], ci, co), compute_dtype)
        return wp.at[:, :w.shape[1], :w.shape[2]].set(w.astype(compute_dtype))

    w1p = _pad_w(w1, Cin_p, Cout_p)               # (K, Cin_p, Cout_p)
    w2p = _pad_w(w2, Cout_p, Cout_p)              # (K, Cout_p, Cout_p)
    b1p = jnp.zeros((1, Cout_p), jnp.float32).at[0, :Cout].set(
        b1.astype(jnp.float32))
    b2p = jnp.zeros((1, Cout_p), jnp.float32).at[0, :Cout].set(
        b2.astype(jnp.float32))

    def _const_spec(shape):
        ndim = len(shape)
        imap = lambda b, t: (0,) * ndim           # grid-invariant block
        if single_buffer_weights:
            try:
                return pl.BlockSpec(shape, imap, pipeline_mode=pl.Buffered(1))
            except Exception:
                pass
        return pl.BlockSpec(shape, imap)

    in_specs = [
        pl.BlockSpec((1, TT, Cin_p), lambda b, t: (b, t, 0)),
        _const_spec((K, Cin_p, Cout_p)),
        _const_spec((1, Cout_p)),
        _const_spec((K, Cout_p, Cout_p)),
        _const_spec((1, Cout_p)),
    ]
    args = [xk, w1p, b1p, w2p, b2p]
    if has_ds:
        wds, bds = params["w_ds"], params["b_ds"]     # (1, Cin, Cout), (Cout,)
        wdsp = jnp.zeros((Cin_p, Cout_p), compute_dtype)
        wdsp = wdsp.at[:Cin, :Cout].set(wds[0].astype(compute_dtype))
        bdsp = jnp.zeros((1, Cout_p), jnp.float32).at[0, :Cout].set(
            bds.astype(jnp.float32))
        in_specs += [_const_spec((Cin_p, Cout_p)), _const_spec((1, Cout_p))]
        args += [wdsp, bdsp]

    scratch_shapes = []
    if K > 1:
        scratch_shapes = [pltpu.VMEM((H_pad + TT, Cin_p), compute_dtype),
                          pltpu.VMEM((H_pad + TT, Cout_p), compute_dtype)]

    kernel = functools.partial(
        _temporal_block_kernel, K=K, dilation=dilation, TT=TT, H=H,
        H_pad=H_pad, has_downsample=has_ds)

    est = _vmem_estimate(TT, Cin_p, Cout_p, K, H_pad, has_ds, cbytes, obytes,
                         wbuf)
    vmem_limit = int(min(max(est + (8 << 20), 16 << 20),
                         max(vmem_cap - (12 << 20), 32 << 20)))

    out = pl.pallas_call(
        kernel,
        out_shape=jax.ShapeDtypeStruct((B, T_pad, Cout_p), out_dtype),
        grid_spec=pltpu.PrefetchScalarGridSpec(
            num_scalar_prefetch=0,
            grid=(B, nT),
            in_specs=in_specs,
            out_specs=pl.BlockSpec((1, TT, Cout_p), lambda b, t: (b, t, 0)),
            scratch_shapes=scratch_shapes,
        ),
        compiler_params=pltpu.CompilerParams(
            dimension_semantics=("parallel", "arbitrary"),
            vmem_limit_bytes=vmem_limit),
        interpret=interpret,
    )(*args)

    if (T != T_pad) or (Cout != Cout_p):
        out = out[:, :T, :Cout]
    return out


# ----------------------------------------------------------------------------
# Parameters (weight_norm folded; synthetic init matching the PyTorch scheme)
# ----------------------------------------------------------------------------
def init_temporal_block_params(key, n_inputs, n_outputs, kernel_size):
    k1, k2, k3, k4, k5, k6 = jax.random.split(key, 6)
    params = {
        "w1": 0.01 * jax.random.normal(
            k1, (kernel_size, n_inputs, n_outputs), jnp.float32),
        "b1": 0.1 * jax.random.normal(k2, (n_outputs,), jnp.float32),
        "w2": 0.01 * jax.random.normal(
            k3, (kernel_size, n_outputs, n_outputs), jnp.float32),
        "b2": 0.1 * jax.random.normal(k4, (n_outputs,), jnp.float32),
    }
    if n_inputs != n_outputs:
        params["w_ds"] = 0.01 * jax.random.normal(
            k5, (1, n_inputs, n_outputs), jnp.float32)
        params["b_ds"] = 0.1 * jax.random.normal(k6, (n_outputs,), jnp.float32)
    return params


# ----------------------------------------------------------------------------
# Pure-JAX reference (for correctness checking only)
# ----------------------------------------------------------------------------
def _causal_conv_ref(x, w, b, dilation):
    T = x.shape[1]
    K = w.shape[0]
    y = jnp.zeros(x.shape[:2] + (w.shape[2],), jnp.float32)
    for k in range(K):
        shift = (K - 1 - k) * dilation
        xs = jnp.pad(x, ((0, 0), (shift, 0), (0, 0)))[:, :T, :]
        y = y + jnp.einsum("btc,co->bto", xs, w[k])
    return y + b


def temporal_block_ref(x, params, dilation):
    h1 = jax.nn.relu(_causal_conv_ref(x, params["w1"], params["b1"], dilation))
    out = jax.nn.relu(_causal_conv_ref(h1, params["w2"], params["b2"], dilation))
    if "w_ds" in params:
        res = jnp.einsum("btc,co->bto", x, params["w_ds"][0]) + params["b_ds"]
    else:
        res = x
    return jax.nn.relu(out + res)


# ----------------------------------------------------------------------------
if __name__ == "__main__":
    key = jax.random.PRNGKey(0)
    TOL = dict(atol=5e-2, rtol=5e-2)   # bf16 storage of activations / weights

    # Case 1: n_inputs != n_outputs (1x1 downsample on residual), dilation=2,
    # multiple time tiles (exercises the causal-halo carry, H_pad <= TT path).
    B, T, Cin, Cout, K, d = 2, 32, 4, 8, 3, 2
    key, kx, kp = jax.random.split(key, 3)
    x = jax.random.normal(kx, (B, T, Cin), jnp.float32)
    params = init_temporal_block_params(kp, Cin, Cout, K)
    out = jax.block_until_ready(
        temporal_block(x, params, kernel_size=K, dilation=d, time_tile=16))
    assert out.shape == (B, T, Cout), out.shape
    ref = temporal_block_ref(x, params, dilation=d)
    assert bool(jnp.allclose(out.astype(jnp.float32), ref, **TOL)), \
        float(jnp.max(jnp.abs(out.astype(jnp.float32) - ref)))

    # Case 2: n_inputs == n_outputs (identity residual), dilation=1.
    B2, T2, C2, d2 = 2, 32, 8, 1
    key, kx2, kp2 = jax.random.split(key, 3)
    x2 = jax.random.normal(kx2, (B2, T2, C2), jnp.float32)
    params2 = init_temporal_block_params(kp2, C2, C2, K)
    out2 = jax.block_until_ready(
        temporal_block(x2, params2, kernel_size=K, dilation=d2, time_tile=8))
    assert out2.shape == (B2, T2, C2), out2.shape
    ref2 = temporal_block_ref(x2, params2, dilation=d2)
    assert bool(jnp.allclose(out2.astype(jnp.float32), ref2, **TOL)), \
        float(jnp.max(jnp.abs(out2.astype(jnp.float32) - ref2)))

    # Case 3: large dilation so H_pad > TT (exercises the overlapping-carry
    # branch) and batch of 1.
    B3, T3, C3, d3 = 1, 64, 8, 16
    key, kx3, kp3 = jax.random.split(key, 3)
    x3 = jax.random.normal(kx3, (B3, T3, C3), jnp.float32)
    params3 = init_temporal_block_params(kp3, C3, C3, K)
    out3 = jax.block_until_ready(
        temporal_block(x3, params3, kernel_size=K, dilation=d3, time_tile=16))
    assert out3.shape == (B3, T3, C3), out3.shape
    ref3 = temporal_block_ref(x3, params3, dilation=d3)
    assert bool(jnp.allclose(out3.astype(jnp.float32), ref3, **TOL)), \
        float(jnp.max(jnp.abs(out3.astype(jnp.float32) - ref3)))

    print("KERNEL_OK")
</pallas_src>

<mosaic_0001>
module attributes {stable_mosaic.version = 11 : i64} {
  func.func @_temporal_block_kernel(%arg0: i32, %arg1: i32, %arg2: memref<1x16x128xbf16, #tpu.memory_space<vmem>>, %arg3: memref<3x128x128xbf16, #tpu.memory_space<vmem>>, %arg4: memref<1x128xf32, #tpu.memory_space<vmem>>, %arg5: memref<3x128x128xbf16, #tpu.memory_space<vmem>>, %arg6: memref<1x128xf32, #tpu.memory_space<vmem>>, %arg7: memref<128x128xbf16, #tpu.memory_space<vmem>>, %arg8: memref<1x128xf32, #tpu.memory_space<vmem>>, %arg9: memref<1x16x128xf32, #tpu.memory_space<vmem>>, %arg10: memref<32x128xbf16, #tpu.memory_space<vmem>>, %arg11: memref<32x128xbf16, #tpu.memory_space<vmem>>) attributes {dimension_semantics = [#tpu.dimension_semantics<parallel>, #tpu.dimension_semantics<arbitrary>], iteration_bounds = array<i64: 2, 2>, scalar_prefetch = 0 : i64, scratch_operands = 2 : i64, tpu.core_type = #tpu.core_type<tc>, window_params = [{transform_indices = @transform_0, window_bounds = array<i64: 1, 16, 128>}, {pipeline_mode = #tpu.pipeline_mode<synchronous>, transform_indices = @transform_1, window_bounds = array<i64: 3, 128, 128>}, {pipeline_mode = #tpu.pipeline_mode<synchronous>, transform_indices = @transform_2, window_bounds = array<i64: 1, 128>}, {pipeline_mode = #tpu.pipeline_mode<synchronous>, transform_indices = @transform_3, window_bounds = array<i64: 3, 128, 128>}, {pipeline_mode = #tpu.pipeline_mode<synchronous>, transform_indices = @transform_4, window_bounds = array<i64: 1, 128>}, {pipeline_mode = #tpu.pipeline_mode<synchronous>, transform_indices = @transform_5, window_bounds = array<i64: 128, 128>}, {pipeline_mode = #tpu.pipeline_mode<synchronous>, transform_indices = @transform_6, window_bounds = array<i64: 1, 128>}, {transform_indices = @transform_7, window_bounds = array<i64: 1, 16, 128>}]} {
    %c0_i32 = arith.constant 0 : i32
    %0 = arith.cmpi eq, %arg1, %c0_i32 : i32
    %1 = arith.extui %0 : i1 to i32
    %c0_i32_0 = arith.constant 0 : i32
    %2 = arith.cmpi ne, %1, %c0_i32_0 : i32
    scf.if %2 {
      %cst_52 = arith.constant 0.000000e+00 : bf16
      %57 = vector.broadcast %cst_52 : bf16 to vector<16x128xbf16>
      %c0_53 = arith.constant 0 : index
      %c0_54 = arith.constant 0 : index
      %58 = vector.load %arg10[%c0_53, %c0_54] : memref<32x128xbf16, #tpu.memory_space<vmem>>, vector<16x128xbf16>
      tpu.vector_store %arg10[%c0_53, %c0_54], %57 {strides = array<i32>} : memref<32x128xbf16, #tpu.memory_space<vmem>>, vector<16x128xbf16>,
      %cst_55 = arith.constant 0.000000e+00 : bf16
      %59 = vector.broadcast %cst_55 : bf16 to vector<16x128xbf16>
      %c0_56 = arith.constant 0 : index
      %c0_57 = arith.constant 0 : index
      %60 = vector.load %arg11[%c0_56, %c0_57] : memref<32x128xbf16, #tpu.memory_space<vmem>>, vector<16x128xbf16>
      tpu.vector_store %arg11[%c0_56, %c0_57], %59 {strides = array<i32>} : memref<32x128xbf16, #tpu.memory_space<vmem>>, vector<16x128xbf16>,
    } else {
    }
    %c0 = arith.constant 0 : index
    %c0_1 = arith.constant 0 : index
    %c0_2 = arith.constant 0 : index
    %3 = vector.load %arg2[%c0, %c0_1, %c0_2] : memref<1x16x128xbf16, #tpu.memory_space<vmem>>, vector<1x16x128xbf16>
    %4 = vector.shape_cast %3 : vector<1x16x128xbf16> to vector<16x128xbf16>
    %c16 = arith.constant 16 : index
    %c0_3 = arith.constant 0 : index
    %5 = vector.load %arg10[%c16, %c0_3] : memref<32x128xbf16, #tpu.memory_space<vmem>>, vector<16x128xbf16>
    tpu.vector_store %arg10[%c16, %c0_3], %4 {strides = array<i32>} : memref<32x128xbf16, #tpu.memory_space<vmem>>, vector<16x128xbf16>,
    %c2 = arith.constant 2 : index
    %c0_4 = arith.constant 0 : index
    %c0_5 = arith.constant 0 : index
    %6 = vector.load %arg3[%c2, %c0_4, %c0_5] : memref<3x128x128xbf16, #tpu.memory_space<vmem>>, vector<1x128x128xbf16>
    %7 = vector.shape_cast %6 : vector<1x128x128xbf16> to vector<128x128xbf16>
    %cst = arith.constant dense<0.000000e+00> : vector<16x128xf32>
    %8 = tpu.matmul %4, %7, %cst {dimension_numbers = #tpu.dot_dimension_numbers<[1], [0], [0], [1], [0, 0, 1, 1], [], []>} : vector<16x128xbf16>, vector<128x128xbf16>, vector<16x128xf32> -> vector<16x128xf32>
    %c12 = arith.constant 12 : index
    %c0_6 = arith.constant 0 : index
    %9 = vector.load %arg10[%c12, %c0_6] : memref<32x128xbf16, #tpu.memory_space<vmem>>, vector<16x128xbf16>
    %c0_7 = arith.constant 0 : index
    %c0_8 = arith.constant 0 : index
    %c0_9 = arith.constant 0 : index
    %10 = vector.load %arg3[%c0_7, %c0_8, %c0_9] : memref<3x128x128xbf16, #tpu.memory_space<vmem>>, vector<1x128x128xbf16>
    %11 = vector.shape_cast %10 : vector<1x128x128xbf16> to vector<128x128xbf16>
    %cst_10 = arith.constant dense<0.000000e+00> : vector<16x128xf32>
    %12 = tpu.matmul %9, %11, %cst_10 {dimension_numbers = #tpu.dot_dimension_numbers<[1], [0], [0], [1], [0, 0, 1, 1], [], []>} : vector<16x128xbf16>, vector<128x128xbf16>, vector<16x128xf32> -> vector<16x128xf32>
    %13 = arith.addf %8, %12 : vector<16x128xf32>
    %c14 = arith.constant 14 : index
    %c0_11 = arith.constant 0 : index
    %14 = vector.load %arg10[%c14, %c0_11] : memref<32x128xbf16, #tpu.memory_space<vmem>>, vector<16x128xbf16>
    %c1 = arith.constant 1 : index
    %c0_12 = arith.constant 0 : index
    %c0_13 = arith.constant 0 : index
    %15 = vector.load %arg3[%c1, %c0_12, %c0_13] : memref<3x128x128xbf16, #tpu.memory_space<vmem>>, vector<1x128x128xbf16>
    %16 = vector.shape_cast %15 : vector<1x128x128xbf16> to vector<128x128xbf16>
    %cst_14 = arith.constant dense<0.000000e+00> : vector<16x128xf32>
    %17 = tpu.matmul %14, %16, %cst_14 {dimension_numbers = #tpu.dot_dimension_numbers<[1], [0], [0], [1], [0, 0, 1, 1], [], []>} : vector<16x128xbf16>, vector<128x128xbf16>, vector<16x128xf32> -> vector<16x128xf32>
    %18 = arith.addf %13, %17 : vector<16x128xf32>
    %c0_15 = arith.constant 0 : index
    %c0_16 = arith.constant 0 : index
    %19 = vector.load %arg4[%c0_15, %c0_16] : memref<1x128xf32, #tpu.memory_space<vmem>>, vector<1x128xf32>
    %20 = vector.broadcast %19 : vector<1x128xf32> to vector<16x128xf32>
    %21 = arith.addf %18, %20 : vector<16x128xf32>
    %cst_17 = arith.constant 0.000000e+00 : f32
    %22 = vector.broadcast %cst_17 : f32 to vector<16x128xf32>
    %23 = arith.maximumf %21, %22 : vector<16x128xf32>
    %24 = arith.truncf %23 : vector<16x128xf32> to vector<16x128xbf16>
    %c16_18 = arith.constant 16 : index
    %c0_19 = arith.constant 0 : index
    %25 = vector.load %arg11[%c16_18, %c0_19] : memref<32x128xbf16, #tpu.memory_space<vmem>>, vector<16x128xbf16>
    tpu.vector_store %arg11[%c16_18, %c0_19], %24 {strides = array<i32>} : memref<32x128xbf16, #tpu.memory_space<vmem>>, vector<16x128xbf16>,
    %c2_20 = arith.constant 2 : index
    %c0_21 = arith.constant 0 : index
    %c0_22 = arith.constant 0 : index
    %26 = vector.load %arg5[%c2_20, %c0_21, %c0_22] : memref<3x128x128xbf16, #tpu.memory_space<vmem>>, vector<1x128x128xbf16>
    %27 = vector.shape_cast %26 : vector<1x128x128xbf16> to vector<128x128xbf16>
    %cst_23 = arith.constant dense<0.000000e+00> : vector<16x128xf32>
    %28 = tpu.matmul %24, %27, %cst_23 {dimension_numbers = #tpu.dot_dimension_numbers<[1], [0], [0], [1], [0, 0, 1, 1], [], []>} : vector<16x128xbf16>, vector<128x128xbf16>, vector<16x128xf32> -> vector<16x128xf32>
    %c12_24 = arith.constant 12 : index
    %c0_25 = arith.constant 0 : index
    %29 = vector.load %arg11[%c12_24, %c0_25] : memref<32x128xbf16, #tpu.memory_space<vmem>>, vector<16x128xbf16>
    %c0_26 = arith.constant 0 : index
    %c0_27 = arith.constant 0 : index
    %c0_28 = arith.constant 0 : index
    %30 = vector.load %arg5[%c0_26, %c0_27, %c0_28] : memref<3x128x128xbf16, #tpu.memory_space<vmem>>, vector<1x128x128xbf16>
    %31 = vector.shape_cast %30 : vector<1x128x128xbf16> to vector<128x128xbf16>
    %cst_29 = arith.constant dense<0.000000e+00> : vector<16x128xf32>
    %32 = tpu.matmul %29, %31, %cst_29 {dimension_numbers = #tpu.dot_dimension_numbers<[1], [0], [0], [1], [0, 0, 1, 1], [], []>} : vector<16x128xbf16>, vector<128x128xbf16>, vector<16x128xf32> -> vector<16x128xf32>
    %33 = arith.addf %28, %32 : vector<16x128xf32>
    %c14_30 = arith.constant 14 : index
    %c0_31 = arith.constant 0 : index
    %34 = vector.load %arg11[%c14_30, %c0_31] : memref<32x128xbf16, #tpu.memory_space<vmem>>, vector<16x128xbf16>
    %c1_32 = arith.constant 1 : index
    %c0_33 = arith.constant 0 : index
    %c0_34 = arith.constant 0 : index
    %35 = vector.load %arg5[%c1_32, %c0_33, %c0_34] : memref<3x128x128xbf16, #tpu.memory_space<vmem>>, vector<1x128x128xbf16>
    %36 = vector.shape_cast %35 : vector<1x128x128xbf16> to vector<128x128xbf16>
    %cst_35 = arith.constant dense<0.000000e+00> : vector<16x128xf32>
    %37 = tpu.matmul %34, %36, %cst_35 {dimension_numbers = #tpu.dot_dimension_numbers<[1], [0], [0], [1], [0, 0, 1, 1], [], []>} : vector<16x128xbf16>, vector<128x128xbf16>, vector<16x128xf32> -> vector<16x128xf32>
    %38 = arith.addf %33, %37 : vector<16x128xf32>
    %c0_36 = arith.constant 0 : index
    %c0_37 = arith.constant 0 : index
    %39 = vector.load %arg6[%c0_36, %c0_37] : memref<1x128xf32, #tpu.memory_space<vmem>>, vector<1x128xf32>
    %40 = vector.broadcast %39 : vector<1x128xf32> to vector<16x128xf32>
    %41 = arith.addf %38, %40 : vector<16x128xf32>
    %cst_38 = arith.constant 0.000000e+00 : f32
    %42 = vector.broadcast %cst_38 : f32 to vector<16x128xf32>
    %43 = arith.maximumf %41, %42 : vector<16x128xf32>
    %c0_39 = arith.constant 0 : index
    %c0_40 = arith.constant 0 : index
    %44 = vector.load %arg7[%c0_39, %c0_40] : memref<128x128xbf16, #tpu.memory_space<vmem>>, vector<128x128xbf16>
    %cst_41 = arith.constant dense<0.000000e+00> : vector<16x128xf32>
    %45 = tpu.matmul %4, %44, %cst_41 {dimension_numbers = #tpu.dot_dimension_numbers<[1], [0], [0], [1], [0, 0, 1, 1], [], []>} : vector<16x128xbf16>, vector<128x128xbf16>, vector<16x128xf32> -> vector<16x128xf32>
    %c0_42 = arith.constant 0 : index
    %c0_43 = arith.constant 0 : index
    %46 = vector.load %arg8[%c0_42, %c0_43] : memref<1x128xf32, #tpu.memory_space<vmem>>, vector<1x128xf32>
    %47 = vector.broadcast %46 : vector<1x128xf32> to vector<16x128xf32>
    %48 = arith.addf %45, %47 : vector<16x128xf32>
    %49 = arith.addf %43, %48 : vector<16x128xf32>
    %cst_44 = arith.constant 0.000000e+00 : f32
    %50 = vector.broadcast %cst_44 : f32 to vector<16x128xf32>
    %51 = arith.maximumf %49, %50 : vector<16x128xf32>
    %c0_45 = arith.constant 0 : index
    %c0_46 = arith.constant 0 : index
    %c0_47 = arith.constant 0 : index
    %52 = vector.load %arg9[%c0_45, %c0_46, %c0_47] : memref<1x16x128xf32, #tpu.memory_space<vmem>>, vector<1x16x128xf32>
    %53 = vector.shape_cast %52 : vector<1x16x128xf32> to vector<16x128xf32>
    %54 = vector.shape_cast %51 : vector<16x128xf32> to vector<1x16x128xf32>
    tpu.vector_store %arg9[%c0_45, %c0_46, %c0_47], %54 {strides = array<i32>} : memref<1x16x128xf32, #tpu.memory_space<vmem>>, vector<1x16x128xf32>,
    %c0_48 = arith.constant 0 : index
    %c0_49 = arith.constant 0 : index
    %55 = vector.load %arg10[%c0_48, %c0_49] : memref<32x128xbf16, #tpu.memory_space<vmem>>, vector<16x128xbf16>
    tpu.vector_store %arg10[%c0_48, %c0_49], %4 {strides = array<i32>} : memref<32x128xbf16, #tpu.memory_space<vmem>>, vector<16x128xbf16>,
    %c0_50 = arith.constant 0 : index
    %c0_51 = arith.constant 0 : index
    %56 = vector.load %arg11[%c0_50, %c0_51] : memref<32x128xbf16, #tpu.memory_space<vmem>>, vector<16x128xbf16>
    tpu.vector_store %arg11[%c0_50, %c0_51], %24 {strides = array<i32>} : memref<32x128xbf16, #tpu.memory_space<vmem>>, vector<16x128xbf16>,
    return
  }
  func.func @transform_0(%arg0: i32, %arg1: i32) -> (i32, i32, i32) {
    %c0_i32 = arith.constant 0 : i32
    %c0_i32_0 = arith.constant 0 : i32
    return %arg0, %arg1, %c0_i32 : i32, i32, i32
  }
  func.func @transform_1(%arg0: i32, %arg1: i32) -> (i32, i32, i32) {
    %c0_i32 = arith.constant 0 : i32
    %c0_i32_0 = arith.constant 0 : i32
    %c0_i32_1 = arith.constant 0 : i32
    %c0_i32_2 = arith.constant 0 : i32
    return %c0_i32, %c0_i32_0, %c0_i32_1 : i32, i32, i32
  }
  func.func @transform_2(%arg0: i32, %arg1: i32) -> (i32, i32) {
    %c0_i32 = arith.constant 0 : i32
    %c0_i32_0 = arith.constant 0 : i32
    %c0_i32_1 = arith.constant 0 : i32
    return %c0_i32, %c0_i32_0 : i32, i32
  }
  func.func @transform_3(%arg0: i32, %arg1: i32) -> (i32, i32, i32) {
    %c0_i32 = arith.constant 0 : i32
    %c0_i32_0 = arith.constant 0 : i32
    %c0_i32_1 = arith.constant 0 : i32
    %c0_i32_2 = arith.constant 0 : i32
    return %c0_i32, %c0_i32_0, %c0_i32_1 : i32, i32, i32
  }
  func.func @transform_4(%arg0: i32, %arg1: i32) -> (i32, i32) {
    %c0_i32 = arith.constant 0 : i32
    %c0_i32_0 = arith.constant 0 : i32
    %c0_i32_1 = arith.constant 0 : i32
    return %c0_i32, %c0_i32_0 : i32, i32
  }
  func.func @transform_5(%arg0: i32, %arg1: i32) -> (i32, i32) {
    %c0_i32 = arith.constant 0 : i32
    %c0_i32_0 = arith.constant 0 : i32
    %c0_i32_1 = arith.constant 0 : i32
    return %c0_i32, %c0_i32_0 : i32, i32
  }
  func.func @transform_6(%arg0: i32, %arg1: i32) -> (i32, i32) {
    %c0_i32 = arith.constant 0 : i32
    %c0_i32_0 = arith.constant 0 : i32
    %c0_i32_1 = arith.constant 0 : i32
    return %c0_i32, %c0_i32_0 : i32, i32
  }
  func.func @transform_7(%arg0: i32, %arg1: i32) -> (i32, i32, i32) {
    %c0_i32 = arith.constant 0 : i32
    %c0_i32_0 = arith.constant 0 : i32
    return %arg0, %arg1, %c0_i32 : i32, i32, i32
  }
}

</mosaic_0001>

<bundles_post_ra>
// kernel: tpu_custom_call.1
= control target key start
LH: loop header
LB: loop body
LE: loop exit
PB: predicated region body
PF: predicated region fallthrough
CT: control target
= control target key end

     0   :  { %s2484_s0 = inlined_call_operand.hbm [shape: bf16[2,32,128], index: 0, kind: input, shape index: {}]   ;;  %s2485_s1 = inlined_call_operand.hbm [shape: bf16[3,128,128], index: 1, kind: input, shape index: {}]   ;;  %s2486_s2 = inlined_call_operand.vmem [shape: f32[1,128], index: 2, kind: input, shape index: {}]   ;;  %s2487_s3 = inlined_call_operand.hbm [shape: bf16[3,128,128], index: 3, kind: input, shape index: {}]   ;;  %s2488_s4 = inlined_call_operand.vmem [shape: f32[1,128], index: 4, kind: input, shape index: {}]   ;;  %s2489_s5 = inlined_call_operand.hbm [shape: bf16[128,128], index: 5, kind: input, shape index: {}]   ;;  %s2490_s6 = inlined_call_operand.vmem [shape: f32[1,128], index: 6, kind: input, shape index: {}]   ;;  %s2491_s7 = inlined_call_operand.hbm [shape: f32[2,32,128], index: 7, kind: output, shape index: {}]  }
   0x1   :  { %2501 = sst [smem:[#allocation20_spill]] %s2485_s1 }
   0x2   :  { %2502 = sst [smem:[#allocation21_spill]] %s2487_s3 }
   0x3   :  { %2503 = sst [smem:[#allocation22_spill]] %s2488_s4 }
   0x4   :  { %2504 = sst [smem:[#allocation23_spill]] %s2489_s5 }
   0x5   :  { %2505 = sst [smem:[#allocation24_spill]] %s2490_s6 }
   0x6   :  { %2506 = sst [smem:[#allocation25_spill]] %s2491_s7 }
   0x7   :  { %12 = vsyncpa [#allocation5], 0 }
   0x8   :  { %14 = vsyncpa [#allocation5 + $0x1], 0 }
   0x9   :  { %15 = vsyncpa [#allocation8], 0 }
   0xa   :  { %16 = vsyncpa [#allocation11], 0 }
   0xb   :  { %17 = vsyncpa [#allocation6], 0 }
   0xc   :  { %19 = vsyncpa [#allocation6 + $0x1], 0  ;;  %s2062_s24 = smov 0   ;;  %s2064_s25 = smov 0  }
   0xd   :  { %s2066_s26 = smov 0   ;;  %s2068_s27 = smov 0  }
   0xe   :  { %s2070_s28 = smov 0   ;;  %s2072_s29 = smov 0  }
   0xf   :  { %s2074_s30 = smov 0   ;;  %s2076_s8 = smov 0  }
  0x10 LB: > { %2507 = sst [smem:[#allocation17_spill]] %s1980_s24  ;;  %s1328_s9 = sadd.s32 4294967295, %s2008_s8   ;;  %s2008_s8 = sphi %s2076_s8, %s25_s8   ;;  %s2004_s30 = sphi %s2074_s30, %s2543_s30   ;;  %s2000_s29 = sphi %s2072_s29, %s2542_s29   ;;  %s1996_s28 = sphi %s2070_s28, %s2541_s28   ;;  %s1992_s27 = sphi %s2068_s27, %s2540_s27   ;;  %s1988_s26 = sphi %s2066_s26, %s2539_s26   ;;  %s1984_s25 = sphi %s2064_s25, %s2538_s25   ;;  %s1980_s24 = sphi %s2062_s24, %s2537_s24  }
  0x11   : > { %2508 = sst [smem:[#allocation18_spill]] %s1996_s28  ;;  %s1329_s10 = sadd.s32 4294967294, %s2008_s8  }
  0x12   : > { %p59_p0 = scmp.ne.s32.totalorder %s1984_s25, %s1980_s24  ;;  %p2106_p1 = scmp.eq.s32.totalorder %s1328_s9, 0 }
  0x13   : > { %p2110_p2 = scmp.eq.s32.totalorder %s1328_s9, 3  ;;  %p217_p3 = scmp.eq.s32.totalorder %s1329_s10, 3 }
  0x14   : > { %s2509_s11 = scalar_select %p2106_p1, 1, 0 }
  0x15   : > { %s2510_s12 = scalar_select %p2110_p2, 1, 0 }
  0x16   : > { %p2116_p4 = por %p2106_p1, %p59_p0  ;;  %p1330_p5 = scmp.ge.s32.totalorder %s2008_s8, 1 }
  0x17   : > { %p2121_p6 = por %p217_p3, %p59_p0  ;;  %p224_p7 = scmp.lt.s32.totalorder %s2008_s8, 5 }
  0x18   : > { %s2511_s13 = scalar_select %p2116_p4, 1, 0 }
  0x19   : > { %s2512_s14 = scalar_select %p2121_p6, 1, 0 }
  0x1a   : > { %p2126_p8 = pnand %p1330_p5, %p224_p7  ;;  %s2010_s16 = smov [#allocation7]  }
  0x1b   : > { %2513 = sst [smem:[#allocation19_spill]] %s2512_s14  ;;  %s236_s17 = sshll.u32 %s2010_s16, 4  ;;  %s2130_s17 = int_to_ptr.vmem [resolvable:$true] %s236_s17 }
  0x1c   : > { %s2514_s15 = scalar_select %p2126_p8, 1, 0 }
  0x1d   : > { %p1631_p9 = pneg %p2126_p8  ;;  %s2011_s19 = smov [#allocation9]  }
  0x1e   : > { %s252_s20 = sshll.u32 %s2011_s19, 4  ;;  %s2012_s21 = smov [#allocation10]   ;;  %s2140_s20 = int_to_ptr.vmem [resolvable:$true] %s252_s20 }
  0x1f   : > { %p2136_p10 = pnand %p1631_p9, %p2106_p1  ;;  %s2142_s22 = sshll.u32 %s2012_s21, 4  ;;  %s269_s22 = int_to_ptr.vmem [resolvable:$true] %s2142_s22 }
  0x20   : > { %s2516_s1 = sld [smem:[#allocation20_spill]] }
  0x21   : > { %p2152_p12 = pneg %p2136_p10 }
  0x26   : > { %s1788_s10 = scalar_lea.hbm %s2516_s1, 3072 }
  0x27   : > { %p1789_p11 = scmp.ne.s32.totalorder %s2516_s1, %s1788_s10  ;;  %p1795_p3 = scmp.lt.u32.totalorder %s1788_s10, %s2516_s1 }
  0x29   : > { %p1791_p13 = pnand %p2152_p12, %p1789_p11 }
  0x2b   : > { %p1792_p0 = pneg %p1791_p13 }
  0x2d   : > { %p1797_p5 = pnand %p1795_p3, %p1792_p0 }
  0x2f   : > { %1800 = shalt.err (!%p1797_p5)
}
  0x30   : > { %s1801_s14 = scalar_lea.vmem %s2130_s17, 3072  ;;  %p1809_p1 = scmp.lt.s32.totalorder %s2130_s17, %s2130_s17 }
  0x31   : > { %p1802_p7 = scmp.ne.s32.totalorder %s2130_s17, %s1801_s14  ;;  %p1810_p4 = scmp.lt.s32.totalorder %s1801_s14, %s1801_s14 }
  0x33   : > { %p1804_p9 = pnand %p1802_p7, %p2152_p12  ;;  %p1811_p11 = por %p1810_p4, %p1809_p1 }
  0x35   : > { %p1805_p6 = pneg %p1804_p9 }
  0x37   : > { %p1812_p13 = pnand %p1811_p11, %p1805_p6 }
  0x39   : > { %1815 = shalt.err (!%p1812_p13)
}
  0x3a   : > { %s2499_s23 = smov 64   ;;  %s2500_s9 = smov 4  }
  0x3b   : > { %1634 = dma.hbm_to_vmem [thread:$0]  (!%p2136_p10), %s2516_s1, 3072, %s2130_s17, [#allocation8], %s2499_s23, %s2499_s23, %s2500_s9  }
  0x3c   : > { %s2518_s3 = sld [smem:[#allocation21_spill]] }
  0x42   : > { %s1816_s14 = scalar_lea.hbm %s2518_s3, 3072 }
  0x43   : > { %p1817_p1 = scmp.ne.s32.totalorder %s2518_s3, %s1816_s14  ;;  %p1823_p0 = scmp.lt.u32.totalorder %s1816_s14, %s2518_s3 }
  0x45   : > { %p1819_p4 = pnand %p1817_p1, %p2152_p12 }
  0x47   : > { %p1820_p6 = pneg %p1819_p4 }
  0x49   : > { %p1825_p3 = pnand %p1823_p0, %p1820_p6 }
  0x4b   : > { %1828 = shalt.err (!%p1825_p3)
}
  0x4c   : > { %s1829_s17 = scalar_lea.vmem %s2140_s20, 3072  ;;  %p1837_p11 = scmp.lt.s32.totalorder %s2140_s20, %s2140_s20 }
  0x4d   : > { %p1830_p5 = scmp.ne.s32.totalorder %s2140_s20, %s1829_s17  ;;  %p1838_p13 = scmp.lt.s32.totalorder %s1829_s17, %s1829_s17 }
  0x4f   : > { %p1832_p7 = pnand %p1830_p5, %p2152_p12  ;;  %p1839_p1 = por %p1838_p13, %p1837_p11 }
  0x51   : > { %p1833_p9 = pneg %p1832_p7 }
  0x53   : > { %p1840_p4 = pnand %p1839_p1, %p1833_p9 }
  0x55   : > { %1843 = shalt.err (!%p1840_p4)
}
  0x56   : > { %1637 = dma.hbm_to_vmem [thread:$0]  (!%p2136_p10), %s2518_s3, 3072, %s2140_s20, [#allocation8], %s2499_s23, %s2499_s23, %s2500_s9  }
  0x57   : > { %s2519_s5 = sld [smem:[#allocation23_spill]] }
  0x5d   : > { %s1844_s10 = scalar_lea.hbm %s2519_s5, 1024 }
  0x5e   : > { %p1845_p6 = scmp.ne.s32.totalorder %s2519_s5, %s1844_s10  ;;  %p1851_p5 = scmp.lt.u32.totalorder %s1844_s10, %s2519_s5 }
  0x60   : > { %p1847_p0 = pnand %p1845_p6, %p2152_p12 }
  0x62   : > { %p1848_p3 = pneg %p1847_p0 }
  0x64   : > { %p1853_p7 = pnand %p1851_p5, %p1848_p3 }
  0x66   : > { %1856 = shalt.err (!%p1853_p7)
}
  0x67   : > { %s1857_s17 = scalar_lea.vmem %s269_s22, 1024  ;;  %p1865_p1 = scmp.lt.s32.totalorder %s269_s22, %s269_s22 }
  0x68   : > { %p1858_p9 = scmp.ne.s32.totalorder %s269_s22, %s1857_s17  ;;  %p1866_p4 = scmp.lt.s32.totalorder %s1857_s17, %s1857_s17 }
  0x6a   : > { %p1860_p11 = pnand %p1858_p9, %p2152_p12  ;;  %p1867_p8 = por %p1866_p4, %p1865_p1 }
  0x6c   : > { %p1861_p13 = pneg %p1860_p11 }
  0x6e   : > { %p1868_p2 = pnand %p1867_p8, %p1861_p13 }
  0x70   : > { %1871 = shalt.err (!%p1868_p2)
}
  0x71   : > { %1640 = dma.hbm_to_vmem [thread:$0]  (!%p2136_p10), %s2519_s5, 1024, %s269_s22, [#allocation11], %s2499_s23, %s2499_s23, %s2500_s9  }
  0x72   : > { %s34_s24 = sadd.s32 1, %s2000_s29  ;;  %s37_s18 = sadd.s32 1, %s2004_s30 }
  0x73   : > { %p35_p2 = scmp.ge.s32.totalorder %s34_s24, 2  ;;  %s46_s6 = sadd.s32 1, %s1988_s26 }
  0x74   : > { %p53_p8 = scmp.ne.s32.totalorder %s1988_s26, %s1984_s25  ;;  %p54_p12 = scmp.eq.s32.totalorder %s2008_s8, 0 }
  0x75   : > { %s2545_s24 = smov (%p35_p2, %s34_s24), 0  ;;  %s2547_s18 = smov (!%p35_p2, %s37_s18), %s2004_s30 }
  0x76   : > { %s42_s7 = ssub.s32 %s2000_s29, %s2545_s24  ;;  %p39_p6 = scmp.ge.s32.totalorder %s2547_s18, 2 }
  0x77   : > { %p2520_p0 = scmp.ne.s32.totalorder %s2510_s12, 0  ;;  %p2241_p10 = por %p54_p12, %p53_p8 }
  0x78   : > { %p1652_p5 = scmp.lt.s32.totalorder %s2008_s8, 4  ;;  %s2549_s18 = smov (%p39_p6, %s2547_s18), 0 }
  0x79   : > { %p2237_p3 = por %p2520_p0, %p53_p8  ;;  %s285_s10 = sand.u32 1, %s1988_s26  }
  0x7a   : > { %s1336_s16 = sshll.u32 %s2000_s29, 1  ;;  %s41_s19 = ssub.s32 %s2004_s30, %s2549_s18 }
  0x7b   : > { %s43_s21 = sor.u32 %s42_s7, %s41_s19  ;;  %s1335_s14 = sshll.u32 %s285_s10, 3 }
  0x7c   : > { %p44_p7 = scmp.eq.s32.totalorder %s43_s21, 0  ;;  %s1337_s12 = sshll.u32 %s2004_s30, 2 }
  0x7d   : > { %s289_s17 = scalar_lea.vmem [#allocation4], %s1335_s14  ;;  %s295_s23 = sadd.s32 %s1337_s12, %s1336_s16 }
  0x7e   : > { %s298_s20 = sshll.u32 %s289_s17, 4  ;;  %s1338_s9 = sshll.u32 %s295_s23, 6  ;;  %s2256_s20 = int_to_ptr.vmem [resolvable:$true] %s298_s20 }
  0x7f   : > { %s2254_s4 = scalar_select %p44_p7, %s1988_s26, %s46_s6  }
  0x80   : > { %p2262_p9 = pnand %p1652_p5, %p2241_p10  ;;  %s2269_s7 = scalar_lea.hbm %s2484_s0, %s1338_s9 }
  0x81   : > { %s2271_s6 = scalar_lea.sflag [#allocation5], %s285_s10  ;;  %s1872_s23 = scalar_lea.hbm %s2269_s7, 128 }
  0x82   : > { %p1873_p11 = scmp.ne.s32.totalorder %s2269_s7, %s1872_s23  ;;  %p1874_p13 = pneg %p2262_p9 }
  0x83   : > { %s1877_s5 = scalar_lea.hbm %s2484_s0, 512  ;;  %p1878_p2 = scmp.lt.u32.totalorder %s2269_s7, %s2484_s0 }
  0x84   : > { %p1875_p1 = pnand %p1874_p13, %p1873_p11  ;;  %p1879_p8 = scmp.lt.u32.totalorder %s1877_s5, %s1872_s23 }
  0x85   : > { %p1881_p6 = scmp.lt.u32.totalorder %s1872_s23, %s2269_s7 }
  0x86   : > { %p1876_p4 = pneg %p1875_p1  ;;  %p1880_p12 = por %p1879_p8, %p1878_p2 }
  0x88   : > { %p1882_p0 = por %p1881_p6, %p1880_p12 }
  0x8a   : > { %p1883_p10 = pnand %p1882_p0, %p1876_p4 }
  0x8c   : > { %1886 = shalt.err (!%p1883_p10)
}
  0x8d   : > { %s1887_s10 = scalar_lea.vmem %s2256_s20, 128  ;;  %s2015_s19 = smov [#allocation4]  }
  0x8e   : > { %p1888_p5 = scmp.ne.s32.totalorder %s2256_s20, %s1887_s10  ;;  %s1892_s21 = sshll.u32 %s2015_s19, 4  ;;  %s1893_s21 = int_to_ptr.vmem [resolvable:$false] %s1892_s21 }
  0x8f   : > { %s1894_s14 = scalar_lea.vmem %s1893_s21, 256  ;;  %p1895_p1 = scmp.lt.s32.totalorder %s2256_s20, %s1893_s21 }
  0x90   : > { %p1890_p7 = pnand %p1888_p5, %p1874_p13  ;;  %p1896_p2 = scmp.lt.s32.totalorder %s1894_s14, %s1887_s10 }
  0x92   : > { %p1891_p11 = pneg %p1890_p7  ;;  %p1897_p8 = por %p1896_p2, %p1895_p1 }
  0x94   : > { %p1898_p12 = pnand %p1897_p8, %p1891_p11 }
  0x96   : > { %1901 = shalt.err (!%p1898_p12)
}
  0x97   : > { %s2524_s12 = smov 4   ;;  %s2525_s17 = smov 64  }
  0x98   : > { %1644 = dma.hbm_to_vmem [thread:$0]  (!%p2262_p9), %s2269_s7, 128, %s2256_s20, %s2271_s6, %s2525_s17, %s2525_s17, %s2524_s12  }
  0x99   : > { %p2526_p13 = scmp.ne.s32.totalorder %s2514_s15, 0 }
  0x9a   : > { %s2305_s23 = sand.u32 (!%p2526_p13), 1, %s1984_s25   ;;  %p2527_p4 = scmp.ne.s32.totalorder (!%p2526_p13), %s2511_s13, 0 }
  0x9b   : > { %310 = sbr.rel (%p2526_p13) target bundleno = 746 (0x2ea), region = 48  ;;  %s1340_s22 = sshll.u32 (!%p2526_p13), %s2305_s23, 3 }
  0x9c   : > { %s313_s3 = scalar_lea.sflag (!%p2526_p13), [#allocation5], %s2305_s23  ;;  %s2309_s5 = scalar_lea.vmem (!%p2526_p13), [#allocation4], %s1340_s22 }
  0xa2   : > { %1963 = dma.done.wait (%p2527_p4), %s313_s3, 128  }
  0xa3   : > { %1965 = vsyncadd (%p2527_p4), %s313_s3, 4294967168  ;;  %p2528_p9 = scmp.ne.s32.totalorder %s2509_s11, 0 }
  0xa5   : > { %1967 = dma.done.wait (%p2528_p9), [#allocation8], 6144  }
  0xa6   : > { %1969 = vsyncadd (%p2528_p9), [#allocation8], 4294961152 }
  0xa7   : > { %1971 = dma.done.wait (%p2528_p9), [#allocation11], 1024  }
  0xa8   : > { %1973 = vsyncadd (%p2528_p9), [#allocation11], 4294966272  ;;  %s1344_s1 = sshll.u32 %s2305_s23, 4  ;;  %p1345_p6 = scmp.ne.s32.totalorder %s1992_s27, 0 }
  0xa9   : > { %s2324_s15 = scalar_lea.vmem [#allocation12], %s1344_s1  ;;  %v2016_v0 = vmov (!%p1345_p6), 0  }
  0xaa   : > { %365 = sbr.rel (%p1345_p6) target bundleno = 177 (0xb1), region = 68  ;;  %366 = vst [vmem:[#allocation2] sm:$0xff] (!%p1345_p6), %v2016_v0  ;;  %367 = vst [vmem:[#allocation3] sm:$0xff] (!%p1345_p6), %v2016_v0 }
  0xb1 PF: > { %v1731_v1 = vld [vmem:[#allocation7] sm:$0xff]   ;;  %v2017_v2 = vmov 0.0   ;;  %v1733_v4 = vld [vmem:[#allocation7 + $0x8] sm:$0xff]   ;;  %vm2018_vm0 = vmmov 0   ;;  %v1735_v6 = vld [vmem:[#allocation7 + $0x10] sm:$0xff]   ;;  %vm414_vm1 = vcmask 1041408  }
  0xb2   : > { %1475 = vmatprep.subr.bf16.mxu0 %v2017_v2  ;;  %1495 = vmatprep.subr.bf16.mxu1 %v2017_v2  ;;  %v1732_v3 = vld [vmem:[#allocation7 + $0x80] sm:$0xff]   ;;  %v1734_v5 = vld [vmem:[#allocation7 + $0x88] sm:$0xff]   ;;  %v1736_v7 = vld [vmem:[#allocation7 + $0x90] sm:$0xff]   ;;  %vm618_vm2 = vcmask 1040384   ;;  %s2529_s20 = sld [smem:[#allocation18_spill]]  ;;  %s2530_s9 = sld [smem:[#allocation22_spill]] }
  0xb3   : > { %1476 = vmatpush3.bf16.msra.mxu0 %v1731_v1  ;;  %1491 = vmatprep.mubr.msk.bf16.mxu0 %vm2018_vm0, %v2017_v2  ;;  %v1737_v8 = vld [vmem:[#allocation7 + $0x18] sm:$0xff]   ;;  %v1739_v10 = vld [vmem:[#allocation7 + $0x20] sm:$0xff]   ;;  %v1741_v13 = vld [vmem:[#allocation7 + $0x28] sm:$0xff]   ;;  %s2531_s19 = sld [smem:[#allocation24_spill]]  ;;  %s1407_s21 = sshll.u32 %s1992_s27, 1 }
  0xb4   : > { %1496 = vmatpush3.bf16.msra.mxu1 %v1732_v3  ;;  %1477 = vmatprep.subr.bf16.mxu0 %v2017_v2  ;;  %v1738_v9 = vld [vmem:[#allocation7 + $0x98] sm:$0xff]   ;;  %v1740_v11 = vld [vmem:[#allocation7 + $0xa0] sm:$0xff]   ;;  %v1742_v14 = vld [vmem:[#allocation7 + $0xa8] sm:$0xff]   ;;  %s1209_s22 = sshll.u32 %s2324_s15, 4  ;;  %s1194_s11 = scalar_lea.sflag [#allocation6], %s2305_s23  ;;  %s2428_s22 = int_to_ptr.vmem [resolvable:$true] %s1209_s22 }
  0xb5   : > { %1497 = vmatprep.subr.bf16.mxu1 %v2017_v2  ;;  %1511 = vmatprep.mubr.msk.bf16.mxu1 %vm2018_vm0, %v2017_v2  ;;  %v2342_v12 = vld [vmem:[%s2309_s5] sm:$0xff]   ;;  %v1748_v24 = vld [vmem:[#allocation7 + $0x40] sm:$0xff]   ;;  %v1749_v26 = vld [vmem:[#allocation7 + $0x48] sm:$0xff]   ;;  %s2532_s5 = sld [smem:[#allocation25_spill]]  ;;  %s1902_s13 = scalar_lea.vmem %s2428_s22, 256 }
  0xb6   : > { %376 = vst [vmem:[#allocation2 + $0x8] sm:$0xff] %v2342_v12  ;;  %v1743_v15 = vld [vmem:[#allocation7 + $0x30] sm:$0xff]   ;;  %v1745_v20 = vld [vmem:[#allocation7 + $0x38] sm:$0xff]   ;;  %v1752_v29 = vld [vmem:[#allocation7 + $0x60] sm:$0xff]   ;;  %p1903_p0 = scmp.ne.s32.totalorder %s2428_s22, %s1902_s13 }
  0xb7   : > { %1478 = vmatpush3.bf16.msra.mxu0 %v1733_v4  ;;  %v1744_v16 = vld [vmem:[#allocation7 + $0xb0] sm:$0xff]   ;;  %v1746_v23 = vld [vmem:[#allocation7 + $0xb8] sm:$0xff]   ;;  %v1753_v30 = vld [vmem:[#allocation7 + $0x68] sm:$0xff]  }
  0xb8   : > { %1498 = vmatpush3.bf16.msra.mxu1 %v1734_v5  ;;  %1479 = vmatprep.subr.bf16.mxu0 %v2017_v2  ;;  %v394_v17 = vld [vmem:[#allocation2] sm:$0xc0]  ;;  %v1751_v28 = vld [vmem:[#allocation7 + $0x58] sm:$0xff]   ;;  %v1756_v37 = vld [vmem:[#allocation9 + $0x80] sm:$0xff]   ;;  %s1408_s14 = sshll.u32 %s2529_s20, 2  ;;  %p1904_p10 = pnand %p1903_p0, %p2237_p3 }
  0xb9   : > { %1499 = vmatprep.subr.bf16.mxu1 %v2017_v2  ;;  %v597_v19 = vld [vmem:[#allocation2] sm:$0x80]  ;;  %v415_v21 = vrot.slane %v394_v17, 6  ;;  %v1755_v33 = vld [vmem:[#allocation7 + $0x78] sm:$0xff]   ;;  %v1759_v38 = vld [vmem:[#allocation9] sm:$0xff]   ;;  %s1206_s12 = sadd.s32 %s1408_s14, %s1407_s21  ;;  %s2019_s20 = smov [#allocation12]  }
  0xba   : > { %1191 = vst [vmem:[#allocation2] sm:$0xff] %v2342_v12  ;;  %v1750_v27 = vld [vmem:[#allocation7 + $0x50] sm:$0xff]   ;;  %v619_v34 = vrot.slane %v597_v19, 7  ;;  %v1757_v39 = vld [vmem:[#allocation9 + $0x88] sm:$0xff]   ;;  %v1760_v43 = vld [vmem:[#allocation9 + $0x98] sm:$0xff]   ;;  %s1409_s17 = sshll.u32 %s1206_s12, 7  ;;  %p1905_p5 = pneg %p1904_p10 }
  0xbb   : > { %1480 = vmatpush3.bf16.msra.mxu0 %v1735_v6  ;;  %v1754_v31 = vld [vmem:[#allocation7 + $0x70] sm:$0xff]   ;;  %v1761_v40 = vld [vmem:[#allocation9 + $0x8] sm:$0xff]   ;;  %v1762_v44 = vld [vmem:[#allocation9 + $0xa0] sm:$0xff]   ;;  %s2426_s1 = scalar_lea.hbm %s2532_s5, %s1409_s17  ;;  %s1906_s7 = sshll.u32 %s2019_s20, 4  ;;  %s1907_s7 = int_to_ptr.vmem [resolvable:$false] %s1906_s7 }
  0xbc   : > { %1500 = vmatpush3.bf16.msra.mxu1 %v1736_v7  ;;  %1481 = vmatprep.subr.bf16.mxu0 %v2017_v2  ;;  %v1758_v41 = vld [vmem:[#allocation9 + $0x90] sm:$0xff]   ;;  %v1764_v45 = vld [vmem:[#allocation9 + $0xa8] sm:$0xff]   ;;  %v1765_v46 = vld [vmem:[#allocation9 + $0x18] sm:$0xff]   ;;  %s1908_s6 = scalar_lea.vmem %s1907_s7, 512  ;;  %p1909_p7 = scmp.lt.s32.totalorder %s2428_s22, %s1907_s7 }
  0xbd   : > { %1501 = vmatprep.subr.bf16.mxu1 %v2017_v2  ;;  %v395_v18 = vld [vmem:[#allocation2 + $0x8] sm:$0x3f]  ;;  %v1763_v42 = vld [vmem:[#allocation9 + $0x10] sm:$0xff]   ;;  %v1767_v48 = vld [vmem:[#allocation9 + $0x20] sm:$0xff]   ;;  %p1910_p11 = scmp.lt.s32.totalorder %s1908_s6, %s1902_s13 }
  0xbe   : > { %v416_v22 = vrot.slane %v395_v18, 6  ;;  %v598_v32 = vld [vmem:[#allocation2 + $0x8] sm:$0x7f]  ;;  %v1766_v47 = vld [vmem:[#allocation9 + $0xb0] sm:$0xff]   ;;  %v1769_v50 = vld [vmem:[#allocation9 + $0x28] sm:$0xff]  }
  0xbf   : > { %1482 = vmatpush3.bf16.msra.mxu0 %v1737_v8  ;;  %v620_v35 = vrot.slane %v598_v32, 7  ;;  %v1768_v49 = vld [vmem:[#allocation9 + $0xb8] sm:$0xff]   ;;  %v1770_v51 = vld [vmem:[#allocation9 + $0x30] sm:$0xff]   ;;  %v1782_v32 = vld [vmem:[#allocation9 + $0x68] sm:$0xff]   ;;  %p1911_p1 = por %p1910_p11, %p1909_p7 }
  0xc0   : > { %1502 = vmatpush3.bf16.msra.mxu1 %v1738_v9  ;;  %1483 = vmatprep.subr.bf16.mxu0 %v2017_v2  ;;  %v417_v25 = vsel %vm414_vm1, %v415_v21, %v416_v22  ;;  %v1771_v52 = vld [vmem:[#allocation9 + $0x38] sm:$0xff]   ;;  %v1371_v0 = vld [vmem:[%s2486_s2] ss:$0 sm:$0xff]  ;;  %v1772_v21 = vld [vmem:[#allocation9 + $0x40] sm:$0xff]  }
  0xc1   : > { %1503 = vmatprep.subr.bf16.mxu1 %v2017_v2  ;;  %v621_v36 = vsel %vm618_vm2, %v619_v34, %v620_v35  ;;  %v1777_v17 = vld [vmem:[#allocation10 + $0x10] sm:$0xff]   ;;  %v1779_v22 = vld [vmem:[#allocation10 + $0x18] sm:$0xff]   ;;  %p1912_p2 = pnand %p1911_p1, %p1905_p5 }
  0xc2   : > { %v1786_v35 = vld [vmem:[#allocation9 + $0x78] sm:$0xff]  }
  0xc3   : > { %1484 = vmatpush3.bf16.msra.mxu0 %v1739_v10 }
  0xc4   : > { %1504 = vmatpush3.bf16.msra.mxu1 %v1740_v11  ;;  %1485 = vmatprep.subr.bf16.mxu0 %v2017_v2  ;;  %v744_v11 = vld [vmem:[#allocation3] sm:$0xc0] }
  0xc5   : > { %1505 = vmatprep.subr.bf16.mxu1 %v2017_v2  ;;  %v764_v18 = vrot.slane %v744_v11, 6 }
  0xc7   : > { %1486 = vmatpush3.bf16.msra.mxu0 %v1741_v13  ;;  %v1773_v13 = vld [vmem:[#allocation10] sm:$0xff]  }
  0xc8   : > { %1506 = vmatpush3.bf16.msra.mxu1 %v1742_v14  ;;  %1487 = vmatprep.subr.bf16.mxu0 %v2017_v2  ;;  %v2390_v14 = vld [vmem:[#allocation3] sm:$0x80] }
  0xc9   : > { %1507 = vmatprep.subr.bf16.mxu1 %v2017_v2 }
  0xcb   : > { %1488 = vmatpush3.bf16.msra.mxu0 %v1743_v15 }
  0xcc   : > { %1508 = vmatpush3.bf16.msra.mxu1 %v1744_v16  ;;  %1489 = vmatprep.subr.bf16.mxu0 %v2017_v2  ;;  %v1775_v16 = vld [vmem:[#allocation10 + $0x8] sm:$0xff]  }
  0xcd   : > { %1509 = vmatprep.subr.bf16.mxu1 %v2017_v2 }
  0xcf   : > { %1490 = vmatpush3.bf16.msra.mxu0 %v1745_v20 }
  0xd0   : > { %1510 = vmatpush3.bf16.msra.mxu1 %v1746_v23  ;;  %1515 = vmatprep.subr.bf16.mxu0 %v2017_v2 }
  0xd1   : > { %1535 = vmatprep.subr.bf16.mxu1 %v2017_v2 }
  0xd2   : > { %1492 = vmatmul.mubr.bf16.vlgmr.msra.gmra.mrb[0].mxu0 %v417_v25  ;;  %v1781_v25 = vld [vmem:[#allocation10 + $0x20] sm:$0xff]  }
  0xd3   : > { %1512 = vmatmul.mubr.bf16.vlgmr.msra.gmra.mrb[0].mxu1 %v2342_v12  ;;  %1516 = vmatpush3.bf16.msra.mxu0 %v1748_v24  ;;  %v1774_v24 = vld [vmem:[#allocation9 + $0x48] sm:$0xff]  }
  0xd4   : > { %1517 = vmatprep.subr.bf16.mxu0 %v2017_v2  ;;  %1531 = vmatprep.mubr.msk.bf16.mxu0 %vm2018_vm0, %v2017_v2 }
  0xd5   : > { %1551 = vmatprep.mubr.msk.bf16.mxu1 %vm2018_vm0, %v2017_v2  ;;  %1536 = vmatpush3.bf16.msra.mxu1 %v1759_v38 }
  0xd6   : > { %1537 = vmatprep.subr.bf16.mxu1 %v2017_v2 }
  0xd7   : > { %1518 = vmatpush3.bf16.msra.mxu0 %v1749_v26  ;;  %v1776_v26 = vld [vmem:[#allocation9 + $0x50] sm:$0xff]  }
  0xd8   : > { %1519 = vmatprep.subr.bf16.mxu0 %v2017_v2 }
  0xd9   : > { %1538 = vmatpush3.bf16.msra.mxu1 %v1761_v40 }
  0xda   : > { %1539 = vmatprep.subr.bf16.mxu1 %v2017_v2 }
  0xdb   : > { %1520 = vmatpush3.bf16.msra.mxu0 %v1750_v27  ;;  %v1783_v27 = vld [vmem:[#allocation10 + $0x28] sm:$0xff]  }
  0xdc   : > { %1521 = vmatprep.subr.bf16.mxu0 %v2017_v2 }
  0xdd   : > { %1540 = vmatpush3.bf16.msra.mxu1 %v1763_v42 }
  0xde   : > { %1541 = vmatprep.subr.bf16.mxu1 %v2017_v2 }
  0xdf   : > { %1522 = vmatpush3.bf16.msra.mxu0 %v1751_v28  ;;  %v1778_v28 = vld [vmem:[#allocation9 + $0x58] sm:$0xff]  }
  0xe0   : > { %1523 = vmatprep.subr.bf16.mxu0 %v2017_v2 }
  0xe1   : > { %1542 = vmatpush3.bf16.msra.mxu1 %v1765_v46 }
  0xe2   : > { %1543 = vmatprep.subr.bf16.mxu1 %v2017_v2 }
  0xe3   : > { %1524 = vmatpush3.bf16.msra.mxu0 %v1752_v29  ;;  %v1785_v29 = vld [vmem:[#allocation10 + $0x30] sm:$0xff]  }
  0xe4   : > { %1525 = vmatprep.subr.bf16.mxu0 %v2017_v2 }
  0xe5   : > { %1544 = vmatpush3.bf16.msra.mxu1 %v1767_v48 }
  0xe6   : > { %1545 = vmatprep.subr.bf16.mxu1 %v2017_v2 }
  0xe7   : > { %1526 = vmatpush3.bf16.msra.mxu0 %v1753_v30  ;;  %v1780_v30 = vld [vmem:[#allocation9 + $0x60] sm:$0xff]  }
  0xe8   : > { %1527 = vmatprep.subr.bf16.mxu0 %v2017_v2 }
  0xe9   : > { %1546 = vmatpush3.bf16.msra.mxu1 %v1769_v50 }
  0xea   : > { %1547 = vmatprep.subr.bf16.mxu1 %v2017_v2 }
  0xeb   : > { %1528 = vmatpush3.bf16.msra.mxu0 %v1754_v31  ;;  %v1787_v31 = vld [vmem:[#allocation10 + $0x38] sm:$0xff]  }
  0xec   : > { %1529 = vmatprep.subr.bf16.mxu0 %v2017_v2 }
  0xed   : > { %1548 = vmatpush3.bf16.msra.mxu1 %v1770_v51 }
  0xee   : > { %1549 = vmatprep.subr.bf16.mxu1 %v2017_v2 }
  0xef   : > { %1530 = vmatpush3.bf16.msra.mxu0 %v1755_v33  ;;  %v1784_v33 = vld [vmem:[#allocation9 + $0x70] sm:$0xff]  }
  0xf0   : > { %1555 = vmatprep.subr.bf16.mxu0 %v2017_v2 }
  0xf1   : > { %1550 = vmatpush3.bf16.msra.mxu1 %v1771_v52  ;;  %v1396_v52 = vld [vmem:[%s2530_s9] ss:$0 sm:$0xff] }
  0xf2   : > { %1532 = vmatmul.mubr.bf16.vlgmr.msra.gmra.mrb[4].mxu0 %v621_v36  ;;  %1575 = vmatprep.subr.bf16.mxu1 %v2017_v2  ;;  %v967_v36 = vrot.slane %v2390_v14, 7 }
  0xf3   : > { %1571 = vmatprep.mubr.msk.bf16.mxu0 %vm2018_vm0, %v2017_v2  ;;  %1556 = vmatpush3.bf16.msra.mxu0 %v1756_v37 }
  0xf4   : > { %1557 = vmatprep.subr.bf16.mxu0 %v2017_v2 }
  0xf7   : > { %1558 = vmatpush3.bf16.msra.mxu0 %v1757_v39 }
  0xf8   : > { %1559 = vmatprep.subr.bf16.mxu0 %v2017_v2 }
  0xfb   : > { %1560 = vmatpush3.bf16.msra.mxu0 %v1758_v41 }
  0xfc   : > { %1561 = vmatprep.subr.bf16.mxu0 %v2017_v2 }
  0xff   : > { %1562 = vmatpush3.bf16.msra.mxu0 %v1760_v43 }
 0x100   : > { %1563 = vmatprep.subr.bf16.mxu0 %v2017_v2 }
 0x103   : > { %1564 = vmatpush3.bf16.msra.mxu0 %v1762_v44 }
 0x104   : > { %1565 = vmatprep.subr.bf16.mxu0 %v2017_v2 }
 0x107   : > { %1566 = vmatpush3.bf16.msra.mxu0 %v1764_v45 }
 0x108   : > { %1567 = vmatprep.subr.bf16.mxu0 %v2017_v2 }
 0x10b   : > { %1568 = vmatpush3.bf16.msra.mxu0 %v1766_v47 }
 0x10c   : > { %1569 = vmatprep.subr.bf16.mxu0 %v2017_v2 }
 0x10f   : > { %1570 = vmatpush3.bf16.msra.mxu0 %v1768_v49 }
 0x110   : > { %1595 = vmatprep.subr.bf16.mxu0 %v2017_v2 }
 0x1a5   : > { %v501_v53 = vpop.f32.mrb[0].mxu0 }
 0x1a6   : > { %v590_v54 = vpop.f32.mrb[0].mxu1  ;;  %v1493_v55 = vpop.f32.mrb[1].mxu0 }
 0x1a7   : > { %v591_v56 = vadd.f32 %v590_v54, %v501_v53  ;;  %v1513_v57 = vpop.f32.mrb[1].mxu1  ;;  %v504_v58 = vpop.f32.mrb[2].mxu0  ;;  %v1397_v53 = vld [vmem:[%s2531_s19] ss:$0 sm:$0xff] }
 0x1a8   : > { %v593_v59 = vpop.f32.mrb[2].mxu1  ;;  %v1494_v60 = vpop.f32.mrb[3].mxu0 }
 0x1a9   : > { %v594_v61 = vadd.f32 %v593_v59, %v504_v58  ;;  %v1514_v62 = vpop.f32.mrb[3].mxu1 }
 0x1c5   : > { %v705_v63 = vpop.f32.mrb[4].mxu0 }
 0x1c6   : > { %v712_v1 = vadd.f32 %v705_v63, %v591_v56  ;;  %v1533_v3 = vpop.f32.mrb[5].mxu0 }
 0x1c7   : > { %v708_v4 = vpop.f32.mrb[6].mxu0 }
 0x1c8   : > { %v721_v5 = vadd.f32 %v1371_v0, %v712_v1  ;;  %v713_v6 = vadd.f32 %v708_v4, %v594_v61  ;;  %v1534_v7 = vpop.f32.mrb[7].mxu0 }
 0x1ca   : > { %v722_v8 = vadd.f32 %v1371_v0, %v713_v6  ;;  %v723_v9 = vmax.f32 %v721_v5, 0.0 }
 0x1cc   : > { %v724_v10 = vmax.f32 %v722_v8, 0.0 }
 0x1ce   : > { %v725_v15 = vpack.c.bf16 %v724_v10, %v723_v9 }
 0x1d0   : > { %726 = vst [vmem:[#allocation3 + $0x8] sm:$0xff] %v725_v15  ;;  %1572 = vmatmul.mubr.bf16.vlgmr.msra.gmra.mrb[8].mxu0 %v725_v15  ;;  %1192 = vst [vmem:[#allocation3] sm:$0xff] %v725_v15 }
 0x1d1   : > { %1596 = vmatpush3.bf16.msra.mxu0 %v1773_v13  ;;  %1611 = vmatprep.mubr.msk.bf16.mxu0 %vm2018_vm0, %v2017_v2 }
 0x1d2   : > { %1597 = vmatprep.subr.bf16.mxu0 %v2017_v2 }
 0x1d5   : > { %1598 = vmatpush3.bf16.msra.mxu0 %v1775_v16 }
 0x1d6   : > { %1599 = vmatprep.subr.bf16.mxu0 %v2017_v2 }
 0x1d7   : > { %v745_v19 = vld [vmem:[#allocation3 + $0x8] sm:$0x3f] }
 0x1d8   : > { %v765_v20 = vrot.slane %v745_v19, 6  ;;  %v947_v34 = vld [vmem:[#allocation3 + $0x8] sm:$0x7f] }
 0x1d9   : > { %1600 = vmatpush3.bf16.msra.mxu0 %v1777_v17  ;;  %v968_v37 = vrot.slane %v947_v34, 7 }
 0x1da   : > { %v766_v23 = vsel %vm414_vm1, %v764_v18, %v765_v20  ;;  %1601 = vmatprep.subr.bf16.mxu0 %v2017_v2 }
 0x1db   : > { %1552 = vmatmul.mubr.bf16.vlgmr.msra.gmra.mrb[4].mxu1 %v766_v23  ;;  %v969_v38 = vsel %vm618_vm2, %v967_v36, %v968_v37 }
 0x1dc   : > { %1576 = vmatpush3.bf16.msra.mxu1 %v1772_v21  ;;  %1591 = vmatprep.mubr.msk.bf16.mxu1 %vm2018_vm0, %v2017_v2 }
 0x1dd   : > { %1577 = vmatprep.subr.bf16.mxu1 %v2017_v2  ;;  %1602 = vmatpush3.bf16.msra.mxu0 %v1779_v22 }
 0x1de   : > { %1603 = vmatprep.subr.bf16.mxu0 %v2017_v2 }
 0x1e0   : > { %1578 = vmatpush3.bf16.msra.mxu1 %v1774_v24 }
 0x1e1   : > { %1579 = vmatprep.subr.bf16.mxu1 %v2017_v2  ;;  %1604 = vmatpush3.bf16.msra.mxu0 %v1781_v25 }
 0x1e2   : > { %1605 = vmatprep.subr.bf16.mxu0 %v2017_v2 }
 0x1e4   : > { %1580 = vmatpush3.bf16.msra.mxu1 %v1776_v26 }
 0x1e5   : > { %1581 = vmatprep.subr.bf16.mxu1 %v2017_v2  ;;  %1606 = vmatpush3.bf16.msra.mxu0 %v1783_v27 }
 0x1e6   : > { %1607 = vmatprep.subr.bf16.mxu0 %v2017_v2 }
 0x1e8   : > { %1582 = vmatpush3.bf16.msra.mxu1 %v1778_v28 }
 0x1e9   : > { %1583 = vmatprep.subr.bf16.mxu1 %v2017_v2  ;;  %1608 = vmatpush3.bf16.msra.mxu0 %v1785_v29 }
 0x1ea   : > { %1609 = vmatprep.subr.bf16.mxu0 %v2017_v2 }
 0x1ec   : > { %1584 = vmatpush3.bf16.msra.mxu1 %v1780_v30 }
 0x1ed   : > { %1585 = vmatprep.subr.bf16.mxu1 %v2017_v2  ;;  %1610 = vmatpush3.bf16.msra.mxu0 %v1787_v31 }
 0x1f0   : > { %1586 = vmatpush3.bf16.msra.mxu1 %v1782_v32  ;;  %1612 = vmatmul.mubr.bf16.vlgmr.msra.gmra.mrb[12].mxu0 %v2342_v12 }
 0x1f1   : > { %1587 = vmatprep.subr.bf16.mxu1 %v2017_v2 }
 0x1f4   : > { %1588 = vmatpush3.bf16.msra.mxu1 %v1784_v33 }
 0x1f5   : > { %1589 = vmatprep.subr.bf16.mxu1 %v2017_v2 }
 0x1f8   : > { %1590 = vmatpush3.bf16.msra.mxu1 %v1786_v35 }
 0x1fb   : > { %1592 = vmatmul.mubr.bf16.vlgmr.msra.gmra.mrb[8].mxu1 %v969_v38 }
 0x2a3   : > { %v939_v39 = vpop.f32.mrb[8].mxu0 }
 0x2a4   : > { %v1573_v40 = vpop.f32.mrb[9].mxu0 }
 0x2a5   : > { %v942_v41 = vpop.f32.mrb[10].mxu0 }
 0x2a6   : > { %v1574_v42 = vpop.f32.mrb[11].mxu0 }
 0x2ae   : > { %v850_v12 = vpop.f32.mrb[4].mxu1 }
 0x2af   : > { %v940_v43 = vadd.f32 %v939_v39, %v850_v12  ;;  %v1553_v44 = vpop.f32.mrb[5].mxu1 }
 0x2b0   : > { %v853_v45 = vpop.f32.mrb[6].mxu1 }
 0x2b1   : > { %v943_v46 = vadd.f32 %v942_v41, %v853_v45  ;;  %v1554_v47 = vpop.f32.mrb[7].mxu1 }
 0x2c3   : > { %v1178_v2 = vpop.f32.mrb[12].mxu0 }
 0x2c4   : > { %v1613_v48 = vpop.f32.mrb[13].mxu0  ;;  %v1179_v58 = vadd.f32 %v1397_v53, %v1178_v2 }
 0x2c5   : > { %v1181_v49 = vpop.f32.mrb[14].mxu0 }
 0x2c6   : > { %v1614_v50 = vpop.f32.mrb[15].mxu0  ;;  %v1182_v1 = vadd.f32 %v1397_v53, %v1181_v49 }
 0x2ce   : > { %v1053_v51 = vpop.f32.mrb[8].mxu1 }
 0x2cf   : > { %v1060_v54 = vadd.f32 %v1053_v51, %v940_v43  ;;  %v1593_v55 = vpop.f32.mrb[9].mxu1 }
 0x2d0   : > { %v1056_v56 = vpop.f32.mrb[10].mxu1 }
 0x2d1   : > { %v1069_v57 = vadd.f32 %v1396_v52, %v1060_v54  ;;  %v1061_v59 = vadd.f32 %v1056_v56, %v943_v46  ;;  %v1594_v60 = vpop.f32.mrb[11].mxu1 }
 0x2d3   : > { %v1071_v61 = vmax.f32 %v1069_v57, 0.0  ;;  %v1070_v62 = vadd.f32 %v1396_v52, %v1061_v59 }
 0x2d5   : > { %v1185_v63 = vadd.f32 %v1179_v58, %v1071_v61  ;;  %v1072_v0 = vmax.f32 %v1070_v62, 0.0 }
 0x2d7   : > { %v1187_v3 = vmax.f32 %v1185_v63, 0.0  ;;  %v1186_v4 = vadd.f32 %v1182_v1, %v1072_v0 }
 0x2d9   : > { %1189 = vst [vmem:[%s2324_s15] sm:$0xff] %v1187_v3  ;;  %v1188_v5 = vmax.f32 %v1186_v4, 0.0 }
 0x2db   : > { %1190 = vst [vmem:[%s2324_s15 + $0x8] sm:$0xff] %v1188_v5 }
 0x2dc   : > { %1915 = shalt.err (!%p1912_p2)
}
 0x2dd   : > { %s1916_s15 = scalar_lea.hbm %s2426_s1, 256  ;;  %s1920_s10 = scalar_lea.hbm %s2532_s5, 1024 }
 0x2de   : > { %p1917_p8 = scmp.ne.s32.totalorder %s2426_s1, %s1916_s15  ;;  %p1921_p4 = scmp.lt.u32.totalorder %s2426_s1, %s2532_s5 }
 0x2df   : > { %p1922_p9 = scmp.lt.u32.totalorder %s1920_s10, %s1916_s15  ;;  %p1924_p0 = scmp.lt.u32.totalorder %s1916_s15, %s2426_s1 }
 0x2e0   : > { %p1918_p12 = pnand %p1917_p8, %p2237_p3 }
 0x2e1   : > { %p1923_p6 = por %p1922_p9, %p1921_p4 }
 0x2e2   : > { %p1919_p13 = pneg %p1918_p12 }
 0x2e3   : > { %p1925_p10 = por %p1924_p0, %p1923_p6 }
 0x2e5   : > { %p1926_p5 = pnand %p1925_p10, %p1919_p13 }
 0x2e7   : > { %1929 = shalt.err (!%p1926_p5)
}
 0x2e8   : > { %s2020_s14 = smov 128   ;;  %s2021_s12 = smov 8  }
 0x2e9   : > { %1629 = dma.vmem_to_hbm [thread:$0]  (%p2237_p3), %s2428_s22, 256, %s2426_s1, %s1194_s11, %s2020_s14, %s2020_s14, %s2021_s12  }
 0x2ea PF: > { %s2533_s17 = sld [smem:[#allocation17_spill]]  ;;  %s2534_s27 = sld [smem:[#allocation19_spill]] }
 0x2eb   : > { %p1656_p7 = scmp.ge.s32.totalorder %s2008_s8, 2 }
 0x2f0   : > { %s1224_s3 = sand.u32 1, %s2533_s17   ;;  %p2535_p11 = scmp.ne.s32.totalorder %s2534_s27, 0 }
 0x2f1   : > { %s1225_s13 = scalar_lea.sflag [#allocation6], %s1224_s3 }
 0x2f2   : > { %p1646_p1 = pnand %p1656_p7, %p2535_p11 }
 0x2f4   : > { %1975 = dma.done.wait (!%p1646_p1), %s1225_s13, 256  }
 0x2f5   : > { %1977 = vsyncadd (!%p1646_p1), %s1225_s13, 4294967040  ;;  %s25_s8 = sadd.s32 1, %s2008_s8   ;;  %s2536_s23 = smov %s2545_s24 }
 0x2f6   : > { %p22_p2 = scmp.ge.s32.totalorder %s25_s8, 6   ;;  %s2537_s24 = smov %s1984_s25 }
 0x2f7   : > { %s2538_s25 = smov %s1988_s26  ;;  %s2539_s26 = smov %s2254_s4 }
 0x2f8   : > { %s2540_s27 = smov %s2000_s29  ;;  %s2541_s28 = smov %s2004_s30 }
 0x2f9   : > { %s2542_s29 = smov %s2536_s23  ;;  %s2543_s30 = smov %s2549_s18 }
 0x2fa   :  { %24 = sbr.rel (!%p22_p2) target bundleno = 16 (0x10), region = 113 }
 0x301   :  { %1230 = vsyncpa [#allocation5], 1 }
 0x302   :  { %1232 = vsyncpa [#allocation5 + $0x1], 1 }
 0x303   :  { %1233 = vsyncpa [#allocation8], 1 }
 0x304   :  { %1234 = vsyncpa [#allocation11], 1 }
 0x305   :  { %1235 = vsyncpa [#allocation6], 1 }
 0x306   :  { %1237 = vsyncpa [#allocation6 + $0x1], 1 }

</bundles_post_ra>
